<compile_context>
chip_gen: v5e
topology: v5e:2x2
jax: 0.10.0
libtpu: 0.0.40
codegen_flags: <defaults>
</compile_context>

<pallas_src>
import jax
import jax.numpy as jnp
from jax.experimental import pallas as pl
from jax.experimental.pallas import tpu as pltpu

NUM_CLASSES = 10
LANE = 128
FEAT_DIM = 1024
MAX_TM = 512  # bf16 feats block at TM=512 is 1 MiB (2 MiB double-buffered)


def head_kernel(x_ref, w_ref, b_ref, o_ref):
    # bf16 x bf16 matmul with f32 accumulation on the MXU.
    h = jnp.dot(x_ref[...], w_ref[...], preferred_element_type=jnp.float32)
    o_ref[...] = jax.nn.sigmoid(h + b_ref[...])


def _round_up(x, m):
    return -(-x // m) * m


def fold_head_params(params):
    """Fold the purely-linear 5-conv head into one (Cin, C_pad) affine map.

    Done once, in plain JAX, outside the per-call forward path. Weights are
    stored bf16 (kernel accumulates in f32); the tiny bias stays f32.
    """
    (c1w, c1b), (p1w, p1b), (c2w, c2b), (p2w, p2b), (fcw, fcb) = params

    # Torch conv weight layout is (Cout, Cin, kH, kW); reduce to (Cin, Cout):
    #   3x3 conv on a 1x1 input with padding=1 -> centre tap w[:, :, 1, 1]
    #   1x1 conv                               -> w[:, :, 0, 0]
    w1 = c1w[:, :, 1, 1].T
    w2 = p1w[:, :, 0, 0].T
    w3 = c2w[:, :, 1, 1].T
    w4 = p2w[:, :, 0, 0].T
    w5 = fcw[:, :, 0, 0].T

    w_total = w1 @ w2 @ w3 @ w4 @ w5
    b_total = c1b
    for w_next, b_next in ((w2, p1b), (w3, c2b), (w4, p2b), (w5, fcb)):
        b_total = b_total @ w_next + b_next

    num_classes = w_total.shape[1]
    # Pad the class dim to exactly one 128-lane vreg width (dense stores);
    # do NOT pad further (memory-bound kernel, wider padding is pure waste).
    c_pad = _round_up(num_classes, LANE)
    if c_pad != num_classes:
        w_total = jnp.pad(w_total, ((0, 0), (0, c_pad - num_classes)))
        b_total = jnp.pad(b_total, (0, c_pad - num_classes))

    return (w_total.astype(jnp.bfloat16),
            b_total.reshape(1, c_pad).astype(jnp.float32),
            num_classes)


def _pick_batch_tile(n):
    """Large tiles amortize the ~0.35us/step overhead; cap TM so the grid has
    >=2 steps when possible (v7x megacore sharding). TM is a multiple of 8
    (sublane) and at most MAX_TM."""
    tm = min(MAX_TM, _round_up(pl.cdiv(n, 2), 8))
    return max(tm, 8)


def modified_googlenet_head(feats, w_total, b_total, num_classes):
    """feats: (N, 1024) GoogLeNet pooled features (any float dtype)."""
    n, d = feats.shape
    c_pad = w_total.shape[1]

    tm = _pick_batch_tile(n)
    n_pad = _round_up(n, tm)

    x = feats.astype(jnp.bfloat16)
    if n_pad != n:
        x = jnp.pad(x, ((0, n_pad - n), (0, 0)))

    grid = (n_pad // tm,)

    cost = pl.CostEstimate(
        flops=2 * n_pad * d * c_pad,
        transcendentals=n_pad * c_pad,                      # sigmoid
        bytes_accessed=(n_pad * d * 2                       # bf16 feats read
                        + d * c_pad * 2 + c_pad * 4         # weights + bias
                        + n_pad * c_pad * 4),               # f32 output write
    )

    out = pl.pallas_call(
        head_kernel,
        out_shape=jax.ShapeDtypeStruct((n_pad, c_pad), jnp.float32),
        grid=grid,
        in_specs=[
            # batch-tiled features
            pl.BlockSpec((tm, d), lambda i: (i, 0)),
            # VMEM-resident weights / bias: constant block index -> single
            # buffer is enough, no need to double-buffer.
            pl.BlockSpec((d, c_pad), lambda i: (0, 0),
                         pipeline_mode=pl.Buffered(1)),
            pl.BlockSpec((1, c_pad), lambda i: (0, 0),
                         pipeline_mode=pl.Buffered(1)),
        ],
        out_specs=pl.BlockSpec((tm, c_pad), lambda i: (i, 0)),
        compiler_params=pltpu.CompilerParams(
            dimension_semantics=("parallel",),
            vmem_limit_bytes=32 * 1024 * 1024,  # valid on v5e/v6e/v7x
        ),
        cost_estimate=cost,
    )(x, w_total, b_total)

    out = out[:n, :num_classes]
    # torch.squeeze on (N, num_classes, 1, 1): for N == 1 the batch dim is
    # squeezed away too; for N > 1 the result is (N, num_classes).
    return out[0] if n == 1 else out


def init_params(key, num_classes):
    """Deterministic PyTorch-default-style (kaiming-uniform-ish) conv init."""
    def conv(key, cout, cin, k):
        kw, kb = jax.random.split(key)
        bound = 1.0 / float((cin * k * k) ** 0.5)
        w = jax.random.uniform(kw, (cout, cin, k, k), jnp.float32, -bound, bound)
        b = jax.random.uniform(kb, (cout,), jnp.float32, -bound, bound)
        return w, b

    k1, k2, k3, k4, k5 = jax.random.split(key, 5)
    conv1 = conv(k1, 1024, 1024, 3)
    pointwise1 = conv(k2, 512, 1024, 1)
    conv2 = conv(k3, 512, 512, 3)
    pointwise2 = conv(k4, 256, 512, 1)
    fc = conv(k5, num_classes, 256, 1)
    return conv1, pointwise1, conv2, pointwise2, fc


def _reference_head(x, params):
    """Unfolded plain-JAX f32 chain matching the PyTorch head semantics."""
    (c1w, c1b), (p1w, p1b), (c2w, c2b), (p2w, p2b), (fcw, fcb) = params
    h = x @ c1w[:, :, 1, 1].T + c1b
    h = h @ p1w[:, :, 0, 0].T + p1b
    h = h @ c2w[:, :, 1, 1].T + c2b
    h = h @ p2w[:, :, 0, 0].T + p2b
    h = h @ fcw[:, :, 0, 0].T + fcb
    return jax.nn.sigmoid(h)


if __name__ == "__main__":
    root = jax.random.PRNGKey(0)
    k_feat, k_params = jax.random.split(root)

    # Stand-in for the GoogLeNet backbone output: (batch=2, 1024) features.
    feats = jax.random.normal(k_feat, (2, FEAT_DIM), jnp.float32)
    params = init_params(k_params, NUM_CLASSES)

    # One-time parameter fold (outside the forward path).
    w_total, b_total, num_classes = fold_head_params(params)

    out = modified_googlenet_head(feats, w_total, b_total, num_classes)
    out = jax.block_until_ready(out)

    ref = _reference_head(feats, params)

    assert out.shape == (2, NUM_CLASSES), out.shape
    assert out.dtype == jnp.float32
    assert bool(jnp.all((out >= 0.0) & (out <= 1.0)))
    assert bool(jnp.allclose(out, ref, atol=2e-3)), float(jnp.max(jnp.abs(out - ref)))
    print("KERNEL_OK")
</pallas_src>

<mosaic_0001>
module attributes {stable_mosaic.version = 11 : i64} {
  func.func @head_kernel(%arg0: i32, %arg1: memref<8x1024xbf16, #tpu.memory_space<vmem>>, %arg2: memref<1024x128xbf16, #tpu.memory_space<vmem>>, %arg3: memref<1x128xf32, #tpu.memory_space<vmem>>, %arg4: memref<8x128xf32, #tpu.memory_space<vmem>>) attributes {dimension_semantics = [#tpu.dimension_semantics<parallel>], iteration_bounds = array<i64: 1>, scalar_prefetch = 0 : i64, scratch_operands = 0 : i64, tpu.core_type = #tpu.core_type<tc>, window_params = [{transform_indices = @transform_0, window_bounds = array<i64: 8, 1024>}, {pipeline_mode = #tpu.pipeline_mode<synchronous>, transform_indices = @transform_1, window_bounds = array<i64: 1024, 128>}, {pipeline_mode = #tpu.pipeline_mode<synchronous>, transform_indices = @transform_2, window_bounds = array<i64: 1, 128>}, {transform_indices = @transform_3, window_bounds = array<i64: 8, 128>}]} {
    %c0 = arith.constant 0 : index
    %c0_0 = arith.constant 0 : index
    %0 = vector.load %arg1[%c0, %c0_0] : memref<8x1024xbf16, #tpu.memory_space<vmem>>, vector<8x1024xbf16>
    %c0_1 = arith.constant 0 : index
    %c0_2 = arith.constant 0 : index
    %1 = vector.load %arg2[%c0_1, %c0_2] : memref<1024x128xbf16, #tpu.memory_space<vmem>>, vector<1024x128xbf16>
    %cst = arith.constant dense<0.000000e+00> : vector<8x128xf32>
    %2 = tpu.matmul %0, %1, %cst {dimension_numbers = #tpu.dot_dimension_numbers<[1], [0], [0], [1], [0, 0, 1, 1], [], []>} : vector<8x1024xbf16>, vector<1024x128xbf16>, vector<8x128xf32> -> vector<8x128xf32>
    %c0_3 = arith.constant 0 : index
    %c0_4 = arith.constant 0 : index
    %3 = vector.load %arg3[%c0_3, %c0_4] : memref<1x128xf32, #tpu.memory_space<vmem>>, vector<1x128xf32>
    %4 = vector.broadcast %3 : vector<1x128xf32> to vector<8x128xf32>
    %5 = arith.addf %2, %4 : vector<8x128xf32>
    %6 = arith.negf %5 : vector<8x128xf32>
    %7 = math.exp %6 : vector<8x128xf32>
    %cst_5 = arith.constant 1.000000e+00 : f32
    %8 = vector.broadcast %cst_5 : f32 to vector<8x128xf32>
    %9 = arith.addf %8, %7 : vector<8x128xf32>
    %10 = arith.divf %8, %9 : vector<8x128xf32>
    %c0_6 = arith.constant 0 : index
    %c0_7 = arith.constant 0 : index
    %11 = vector.load %arg4[%c0_6, %c0_7] : memref<8x128xf32, #tpu.memory_space<vmem>>, vector<8x128xf32>
    tpu.vector_store %arg4[%c0_6, %c0_7], %10 {strides = array<i32>} : memref<8x128xf32, #tpu.memory_space<vmem>>, vector<8x128xf32>,
    return
  }
  func.func @transform_0(%arg0: i32) -> (i32, i32) {
    %c0_i32 = arith.constant 0 : i32
    %c0_i32_0 = arith.constant 0 : i32
    return %arg0, %c0_i32 : i32, i32
  }
  func.func @transform_1(%arg0: i32) -> (i32, i32) {
    %c0_i32 = arith.constant 0 : i32
    %c0_i32_0 = arith.constant 0 : i32
    %c0_i32_1 = arith.constant 0 : i32
    return %c0_i32, %c0_i32_0 : i32, i32
  }
  func.func @transform_2(%arg0: i32) -> (i32, i32) {
    %c0_i32 = arith.constant 0 : i32
    %c0_i32_0 = arith.constant 0 : i32
    %c0_i32_1 = arith.constant 0 : i32
    return %c0_i32, %c0_i32_0 : i32, i32
  }
  func.func @transform_3(%arg0: i32) -> (i32, i32) {
    %c0_i32 = arith.constant 0 : i32
    %c0_i32_0 = arith.constant 0 : i32
    return %arg0, %c0_i32 : i32, i32
  }
}

</mosaic_0001>

<bundles_post_ra>
// kernel: tpu_custom_call.1
= control target key start
LH: loop header
LB: loop body
LE: loop exit
PB: predicated region body
PF: predicated region fallthrough
CT: control target
= control target key end

     0   :  { %8 = vsyncpa [#allocation3], 0  ;;  %s1181_s0 = inlined_call_operand.hbm [shape: bf16[8,1024], index: 0, kind: input, shape index: {}]   ;;  %s1182_s1 = inlined_call_operand.hbm [shape: bf16[1024,128], index: 1, kind: input, shape index: {}]   ;;  %s1183_s2 = inlined_call_operand.vmem [shape: f32[1,128], index: 2, kind: input, shape index: {}]   ;;  %s1184_s3 = inlined_call_operand.hbm [shape: f32[8,128], index: 3, kind: output, shape index: {}]  }
   0x1   :  { %9 = vsyncpa [#allocation6], 0 }
   0x2   :  { %10 = vsyncpa [#allocation4], 0  ;;  %s16_s14 = sshll.u32 %s1181_s0, 4  ;;  %s1144_s15 = smov [#allocation2]   ;;  %s17_s14 = int_to_ptr.hbm [resolvable:$true] %s16_s14 }
   0x3   :  { %s18_s16 = sshll.u32 %s1144_s15, 4  ;;  %s26_s19 = sshll.u32 %s1182_s1, 4  ;;  %s19_s16 = int_to_ptr.vmem [resolvable:$true] %s18_s16  ;;  %s27_s19 = int_to_ptr.hbm [resolvable:$true] %s26_s19 }
   0x4   :  { %21 = dma.hbm_to_vmem [thread:$0]  %s17_s14, 512, %s19_s16, [#allocation3]  }
   0x5   :  { %s1145_s20 = smov [#allocation5]   ;;  %s1146_s22 = smov 64  }
   0x6   :  { %s28_s21 = sshll.u32 %s1145_s20, 4  ;;  %s1147_s23 = smov 4   ;;  %s29_s21 = int_to_ptr.vmem [resolvable:$true] %s28_s21 }
   0x7   :  { %34 = dma.hbm_to_vmem [thread:$0]  %s27_s19, 8192, %s29_s21, [#allocation6], %s1146_s22, %s1146_s22, %s1147_s23  }
   0x8   :  { %1138 = dma.done.wait [#allocation3], 512  }
   0x9   :  { %1139 = vsyncadd [#allocation3], 4294966784 }
   0xa   :  { %1140 = dma.done.wait [#allocation6], 8192  }
   0xb   :  { %1141 = vsyncadd [#allocation6], 4294959104  ;;  %v999_v0 = vld [vmem:[#allocation5 + $0x38] sm:$0xff]  ;;  %v998_v4 = vld [vmem:[#allocation5 + $0x30] sm:$0xff]  ;;  %s724_s27 = sshll.u32 %s1184_s3, 4  ;;  %s725_s27 = int_to_ptr.hbm [resolvable:$true] %s724_s27 }
   0xc   :  { %v1007_v1 = vld [vmem:[#allocation5 + $0x78] sm:$0xff]  ;;  %593 = vmatpush.bf16.msra.mxu0 %v999_v0  ;;  %v1006_v5 = vld [vmem:[#allocation5 + $0x70] sm:$0xff]  ;;  %v997_v8 = vld [vmem:[#allocation5 + $0x28] sm:$0xff] }
   0xd   :  { %v1015_v2 = vld [vmem:[#allocation5 + $0xb8] sm:$0xff]  ;;  %606 = vmatpush.bf16.msra.mxu1 %v1007_v1  ;;  %v1014_v6 = vld [vmem:[#allocation5 + $0xb0] sm:$0xff]  ;;  %v1005_v9 = vld [vmem:[#allocation5 + $0x68] sm:$0xff] }
   0xe   :  { %v1023_v3 = vld [vmem:[#allocation5 + $0xf8] sm:$0xff]  ;;  %619 = vmatpush.bf16.msra.mxu2 %v1015_v2  ;;  %v1022_v7 = vld [vmem:[#allocation5 + $0xf0] sm:$0xff]  ;;  %v1013_v10 = vld [vmem:[#allocation5 + $0xa8] sm:$0xff] }
   0xf   :  { %632 = vmatpush.bf16.msra.mxu3 %v1023_v3  ;;  %v1021_v11 = vld [vmem:[#allocation5 + $0xe8] sm:$0xff]  ;;  %v996_v12 = vld [vmem:[#allocation5 + $0x20] sm:$0xff]  ;;  %v995_v16 = vld [vmem:[#allocation5 + $0x18] sm:$0xff] }
  0x10   :  { %594 = vmatpush.bf16.msra.mxu0 %v998_v4  ;;  %v1004_v13 = vld [vmem:[#allocation5 + $0x60] sm:$0xff]  ;;  %v1003_v17 = vld [vmem:[#allocation5 + $0x58] sm:$0xff]  ;;  %v994_v20 = vld [vmem:[#allocation5 + $0x10] sm:$0xff] }
  0x11   :  { %607 = vmatpush.bf16.msra.mxu1 %v1006_v5  ;;  %v1012_v14 = vld [vmem:[#allocation5 + $0xa0] sm:$0xff]  ;;  %v1011_v18 = vld [vmem:[#allocation5 + $0x98] sm:$0xff]  ;;  %v1002_v21 = vld [vmem:[#allocation5 + $0x50] sm:$0xff] }
  0x12   :  { %620 = vmatpush.bf16.msra.mxu2 %v1014_v6  ;;  %v1020_v15 = vld [vmem:[#allocation5 + $0xe0] sm:$0xff]  ;;  %v1019_v19 = vld [vmem:[#allocation5 + $0xd8] sm:$0xff]  ;;  %v1010_v22 = vld [vmem:[#allocation5 + $0x90] sm:$0xff] }
  0x13   :  { %633 = vmatpush.bf16.msra.mxu3 %v1022_v7  ;;  %v1018_v23 = vld [vmem:[#allocation5 + $0xd0] sm:$0xff]  ;;  %v993_v24 = vld [vmem:[#allocation5 + $0x8] sm:$0xff]  ;;  %v45_v29 = vld [vmem:[#allocation2] sm:$0xff] }
  0x14   :  { %595 = vmatpush.bf16.msra.mxu0 %v997_v8  ;;  %v1001_v25 = vld [vmem:[#allocation5 + $0x48] sm:$0xff]  ;;  %v992_v30 = vld [vmem:[#allocation5] sm:$0xff]  ;;  %v185_v33 = vunpack.c.l.b16 %v45_v29  ;;  %v186_v37 = vunpack.c.h.b16 %v45_v29  ;;  %v1031_v38 = vld [vmem:[#allocation5 + $0x138] sm:$0xff] }
  0x15   :  { %608 = vmatpush.bf16.msra.mxu1 %v1005_v9  ;;  %v1009_v26 = vld [vmem:[#allocation5 + $0x88] sm:$0xff]  ;;  %v1000_v31 = vld [vmem:[#allocation5 + $0x40] sm:$0xff]  ;;  %v1039_v39 = vld [vmem:[#allocation5 + $0x178] sm:$0xff] }
  0x16   :  { %621 = vmatpush.bf16.msra.mxu2 %v1013_v10  ;;  %v1017_v27 = vld [vmem:[#allocation5 + $0xc8] sm:$0xff]  ;;  %v1008_v34 = vld [vmem:[#allocation5 + $0x80] sm:$0xff]  ;;  %v1047_v40 = vld [vmem:[#allocation5 + $0x1b8] sm:$0xff]  ;;  %v193_v43 = vpack.c.b16 %v185_v33, %v185_v33  ;;  %v194_v45 = vpack.c.b16 %v186_v37, %v186_v37 }
  0x17   :  { %634 = vmatpush.bf16.msra.mxu3 %v1021_v11  ;;  %v46_v28 = vld [vmem:[#allocation2 + $0x8] sm:$0xff]  ;;  %v1016_v35 = vld [vmem:[#allocation5 + $0xc0] sm:$0xff]  ;;  %v1055_v41 = vld [vmem:[#allocation5 + $0x1f8] sm:$0xff] }
  0x18   :  { %596 = vmatpush.bf16.msra.mxu0 %v996_v12  ;;  %v187_v32 = vunpack.c.l.b16 %v46_v28  ;;  %v188_v36 = vunpack.c.h.b16 %v46_v28  ;;  %v1030_v46 = vld [vmem:[#allocation5 + $0x130] sm:$0xff]  ;;  %v1029_v50 = vld [vmem:[#allocation5 + $0x128] sm:$0xff]  ;;  %v1028_v54 = vld [vmem:[#allocation5 + $0x120] sm:$0xff] }
  0x19   :  { %609 = vmatpush.bf16.msra.mxu1 %v1004_v13  ;;  %v1038_v47 = vld [vmem:[#allocation5 + $0x170] sm:$0xff]  ;;  %v1037_v51 = vld [vmem:[#allocation5 + $0x168] sm:$0xff]  ;;  %v1036_v55 = vld [vmem:[#allocation5 + $0x160] sm:$0xff] }
  0x1a   :  { %622 = vmatpush.bf16.msra.mxu2 %v1012_v14  ;;  %v195_v42 = vpack.c.b16 %v187_v32, %v187_v32  ;;  %v196_v44 = vpack.c.b16 %v188_v36, %v188_v36  ;;  %v1046_v48 = vld [vmem:[#allocation5 + $0x1b0] sm:$0xff]  ;;  %v1045_v52 = vld [vmem:[#allocation5 + $0x1a8] sm:$0xff]  ;;  %v1044_v56 = vld [vmem:[#allocation5 + $0x1a0] sm:$0xff] }
  0x1b   :  { %635 = vmatpush.bf16.msra.mxu3 %v1020_v15  ;;  %v1054_v49 = vld [vmem:[#allocation5 + $0x1f0] sm:$0xff]  ;;  %v1053_v53 = vld [vmem:[#allocation5 + $0x1e8] sm:$0xff]  ;;  %v1052_v57 = vld [vmem:[#allocation5 + $0x1e0] sm:$0xff] }
  0x1c   :  { %597 = vmatpush.bf16.msra.mxu0 %v995_v16  ;;  %v1027_v58 = vld [vmem:[#allocation5 + $0x118] sm:$0xff]  ;;  %v1026_v62 = vld [vmem:[#allocation5 + $0x110] sm:$0xff]  ;;  %v1025_v2 = vld [vmem:[#allocation5 + $0x108] sm:$0xff] }
  0x1d   :  { %610 = vmatpush.bf16.msra.mxu1 %v1003_v17  ;;  %v1035_v59 = vld [vmem:[#allocation5 + $0x158] sm:$0xff]  ;;  %v1034_v63 = vld [vmem:[#allocation5 + $0x150] sm:$0xff]  ;;  %v1033_v3 = vld [vmem:[#allocation5 + $0x148] sm:$0xff] }
  0x1e   :  { %623 = vmatpush.bf16.msra.mxu2 %v1011_v18  ;;  %v1043_v60 = vld [vmem:[#allocation5 + $0x198] sm:$0xff]  ;;  %v1042_v0 = vld [vmem:[#allocation5 + $0x190] sm:$0xff]  ;;  %v1041_v5 = vld [vmem:[#allocation5 + $0x188] sm:$0xff] }
  0x1f   :  { %636 = vmatpush.bf16.msra.mxu3 %v1019_v19  ;;  %v1051_v61 = vld [vmem:[#allocation5 + $0x1d8] sm:$0xff]  ;;  %v1050_v1 = vld [vmem:[#allocation5 + $0x1d0] sm:$0xff]  ;;  %v1049_v6 = vld [vmem:[#allocation5 + $0x1c8] sm:$0xff] }
  0x20   :  { %598 = vmatpush.bf16.msra.mxu0 %v994_v20  ;;  %v47_v4 = vld [vmem:[#allocation2 + $0x10] sm:$0xff]  ;;  %v48_v7 = vld [vmem:[#allocation2 + $0x18] sm:$0xff]  ;;  %v1024_v10 = vld [vmem:[#allocation5 + $0x100] sm:$0xff] }
  0x21   :  { %611 = vmatpush.bf16.msra.mxu1 %v1002_v21  ;;  %v189_v8 = vunpack.c.l.b16 %v47_v4  ;;  %v190_v9 = vunpack.c.h.b16 %v47_v4  ;;  %v1032_v11 = vld [vmem:[#allocation5 + $0x140] sm:$0xff]  ;;  %v191_v12 = vunpack.c.l.b16 %v48_v7  ;;  %v192_v13 = vunpack.c.h.b16 %v48_v7 }
  0x22   :  { %624 = vmatpush.bf16.msra.mxu2 %v1010_v22  ;;  %v1040_v14 = vld [vmem:[#allocation5 + $0x180] sm:$0xff] }
  0x23   :  { %637 = vmatpush.bf16.msra.mxu3 %v1018_v23  ;;  %v1048_v15 = vld [vmem:[#allocation5 + $0x1c0] sm:$0xff]  ;;  %v197_v16 = vpack.c.b16 %v189_v8, %v189_v8  ;;  %v198_v17 = vpack.c.b16 %v190_v9, %v190_v9  ;;  %v199_v18 = vpack.c.b16 %v191_v12, %v191_v12  ;;  %v200_v19 = vpack.c.b16 %v192_v13, %v192_v13 }
  0x24   :  { %599 = vmatpush.bf16.msra.mxu0 %v993_v24 }
  0x25   :  { %612 = vmatpush.bf16.msra.mxu1 %v1001_v25 }
  0x26   :  { %625 = vmatpush.bf16.msra.mxu2 %v1009_v26  ;;  %v1061_v26 = vld [vmem:[%s1183_s2] ss:$0 sm:$0xff]  ;;  %s1148_s2 = smov [#allocation7]  }
  0x27   :  { %638 = vmatpush.bf16.msra.mxu3 %v1017_v27  ;;  %s722_s24 = sshll.u32 %s1148_s2, 4  ;;  %s723_s24 = int_to_ptr.vmem [resolvable:$true] %s722_s24 }
  0x28   :  { %600 = vmatpush.bf16.msra.mxu0 %v992_v30 }
  0x29   :  { %613 = vmatpush.bf16.msra.mxu1 %v1000_v31 }
  0x2a   :  { %626 = vmatpush.bf16.msra.mxu2 %v1008_v34 }
  0x2b   :  { %639 = vmatpush.bf16.msra.mxu3 %v1016_v35  ;;  %601 = vmatmul.bf16.vlgmr.msra.gmra.mxu0 %v193_v43 }
  0x2c   :  { %645 = vmatpush.bf16.msrb.mxu0 %v1031_v38  ;;  %614 = vmatmul.bf16.vlgmr.msra.gmra.mxu1 %v194_v45 }
  0x2d   :  { %658 = vmatpush.bf16.msrb.mxu1 %v1039_v39  ;;  %627 = vmatmul.bf16.vlgmr.msra.gmra.mxu2 %v195_v42 }
  0x2e   :  { %671 = vmatpush.bf16.msrb.mxu2 %v1047_v40  ;;  %640 = vmatmul.bf16.vlgmr.msra.gmra.mxu3 %v196_v44 }
  0x2f   :  { %684 = vmatpush.bf16.msrb.mxu3 %v1055_v41 }
  0x30   :  { %646 = vmatpush.bf16.msrb.mxu0 %v1030_v46 }
  0x31   :  { %659 = vmatpush.bf16.msrb.mxu1 %v1038_v47 }
  0x32   :  { %672 = vmatpush.bf16.msrb.mxu2 %v1046_v48 }
  0x33   :  { %685 = vmatpush.bf16.msrb.mxu3 %v1054_v49 }
  0x34   :  { %647 = vmatpush.bf16.msrb.mxu0 %v1029_v50 }
  0x35   :  { %660 = vmatpush.bf16.msrb.mxu1 %v1037_v51 }
  0x36   :  { %673 = vmatpush.bf16.msrb.mxu2 %v1045_v52 }
  0x37   :  { %686 = vmatpush.bf16.msrb.mxu3 %v1053_v53 }
  0x38   :  { %648 = vmatpush.bf16.msrb.mxu0 %v1028_v54 }
  0x39   :  { %661 = vmatpush.bf16.msrb.mxu1 %v1036_v55 }
  0x3a   :  { %674 = vmatpush.bf16.msrb.mxu2 %v1044_v56 }
  0x3b   :  { %687 = vmatpush.bf16.msrb.mxu3 %v1052_v57 }
  0x3c   :  { %649 = vmatpush.bf16.msrb.mxu0 %v1027_v58 }
  0x3d   :  { %662 = vmatpush.bf16.msrb.mxu1 %v1035_v59 }
  0x3e   :  { %675 = vmatpush.bf16.msrb.mxu2 %v1043_v60 }
  0x3f   :  { %688 = vmatpush.bf16.msrb.mxu3 %v1051_v61 }
  0x40   :  { %650 = vmatpush.bf16.msrb.mxu0 %v1026_v62 }
  0x41   :  { %663 = vmatpush.bf16.msrb.mxu1 %v1034_v63 }
  0x42   :  { %676 = vmatpush.bf16.msrb.mxu2 %v1042_v0 }
  0x43   :  { %689 = vmatpush.bf16.msrb.mxu3 %v1050_v1 }
  0x44   :  { %651 = vmatpush.bf16.msrb.mxu0 %v1025_v2 }
  0x45   :  { %664 = vmatpush.bf16.msrb.mxu1 %v1033_v3 }
  0x46   :  { %677 = vmatpush.bf16.msrb.mxu2 %v1041_v5 }
  0x47   :  { %690 = vmatpush.bf16.msrb.mxu3 %v1049_v6 }
  0x48   :  { %652 = vmatpush.bf16.msrb.mxu0 %v1024_v10 }
  0x49   :  { %665 = vmatpush.bf16.msrb.mxu1 %v1032_v11 }
  0x4a   :  { %678 = vmatpush.bf16.msrb.mxu2 %v1040_v14 }
  0x4b   :  { %691 = vmatpush.bf16.msrb.mxu3 %v1048_v15  ;;  %653 = vmatmul.bf16.vlgmr.msrb.gmra.mxu0 %v197_v16 }
  0x4c   :  { %666 = vmatmul.bf16.vlgmr.msrb.gmra.mxu1 %v198_v17 }
  0x4d   :  { %679 = vmatmul.bf16.vlgmr.msrb.gmra.mxu2 %v199_v18 }
  0x4e   :  { %692 = vmatmul.bf16.vlgmr.msrb.gmra.mxu3 %v200_v19 }
  0xa8   :  { %v602_v20 = vpop.f32.mrf.mxu0 }
  0xa9   :  { %v615_v21 = vpop.f32.mrf.mxu1  ;;  %v603_v29 = vadd.f32 %v1061_v26, %v602_v20 }
  0xab   :  { %v616_v30 = vadd.f32 %v615_v21, %v603_v29 }
  0xb0   :  { %v628_v22 = vpop.f32.mrf.mxu2  ;;  %v604_v24 = vpop.f32.mrf.mxu0 }
  0xb1   :  { %v641_v23 = vpop.f32.mrf.mxu3  ;;  %v617_v25 = vpop.f32.mrf.mxu1  ;;  %v629_v31 = vadd.f32 %v628_v22, %v616_v30 }
  0xb3   :  { %v642_v32 = vadd.f32 %v641_v23, %v629_v31 }
  0xb8   :  { %v630_v27 = vpop.f32.mrf.mxu2 }
  0xb9   :  { %v643_v28 = vpop.f32.mrf.mxu3 }
  0xc8   :  { %v654_v33 = vpop.f32.mrf.mxu0 }
  0xc9   :  { %v667_v34 = vpop.f32.mrf.mxu1  ;;  %v655_v35 = vadd.f32 %v654_v33, %v642_v32 }
  0xcb   :  { %v668_v36 = vadd.f32 %v667_v34, %v655_v35 }
  0xd0   :  { %v680_v37 = vpop.f32.mrf.mxu2  ;;  %v656_v40 = vpop.f32.mrf.mxu0 }
  0xd1   :  { %v693_v38 = vpop.f32.mrf.mxu3  ;;  %v681_v39 = vadd.f32 %v680_v37, %v668_v36  ;;  %v669_v41 = vpop.f32.mrf.mxu1 }
  0xd3   :  { %v694_v42 = vadd.f32 %v693_v38, %v681_v39 }
  0xd5   :  { %v991_v43 = vmul.f32 -1.442695, %v694_v42 }
  0xd7   :  { %1062 = vpow2.f32 %v991_v43 }
  0xd8   :  { %v682_v44 = vpop.f32.mrf.mxu2 }
  0xd9   :  { %v695_v45 = vpop.f32.mrf.mxu3 }
  0xdd   :  { %v1063_v46 = vpop.eup %1062 }
  0xde   :  { %v700_v47 = vadd.f32 1.0, %v1063_v46 }
  0xe0   :  { %1064 = vrcp.f32 %v700_v47  ;;  %v712_v51 = vand.u32 2147483648, %v700_v47  ;;  %v710_v53 = vand.u32 2147483647, %v700_v47  ;;  %vm706_vm1 = vweird.f32 %v700_v47 }
  0xe2   :  { %v713_v55 = vor.u32 1.1754944e-38, %v712_v51  ;;  %vm711_vm3 = vcmp.eq.f32.partialorder %v710_v53, 8.507059e+37 }
  0xe6   :  { %v1065_v48 = vpop.eup %1064 }
  0xe7   :  { %v702_v49 = vmul.f32 %v1065_v48, %v700_v47  ;;  %vm707_vm0 = vweird.f32 %v1065_v48 }
  0xe8   :  { %vm708_vm2 = vmor %vm706_vm1, %vm707_vm0 }
  0xe9   :  { %v703_v50 = vsub.f32 1.0, %v702_v49 }
  0xeb   :  { %v704_v52 = vmul.f32 %v1065_v48, %v703_v50 }
  0xed   :  { %v705_v54 = vadd.f32 %v1065_v48, %v704_v52 }
  0xef   :  { %v709_v56 = vsel %vm708_vm2, %v1065_v48, %v705_v54 }
  0xf0   :  { %v714_v57 = vsel %vm711_vm3, %v713_v55, %v709_v56 }
  0xf1   :  { %716 = vst [vmem:[#allocation7] sm:$0xff] %v714_v57 }
  0xf2   :  { %727 = dma.vmem_to_hbm [thread:$0]  %s723_s24, 128, %s725_s27, [#allocation4]  }
  0xf3   :  { %1142 = dma.done.wait [#allocation4], 128  }
  0xf4   :  { %1143 = vsyncadd [#allocation4], 4294967168 }
  0xf5   :  { %732 = vsyncpa [#allocation3], 1 }
  0xf6   :  { %733 = vsyncpa [#allocation6], 1 }
  0xf7   :  { %734 = vsyncpa [#allocation4], 1 }

</bundles_post_ra>
